<compile_context>
chip_gen: v7x
topology: tpu7x:2x2x1
jax: 0.10.0
libtpu: 0.0.40
codegen_flags: <defaults>
</compile_context>

<pallas_src>
import math
import jax
import jax.numpy as jnp
from jax import lax
from jax.experimental import pallas as pl
from jax.experimental.pallas import tpu as pltpu

# small, module-consistent shapes
B, S, D, H, FF = 2, 8, 32, 4, 64
DK = D // H
BS = B * S
EPS = 1e-6

# packed weight slab: lane offsets are multiples of 128 (vreg-column aligned slices)
WQKV_OFF, WO_OFF, W1_OFF, W2_OFF = 0, 128, 256, 384
WPACK_H, WPACK_W = 2 * D, 512            # 64 rows so W2 (64,32) fits alongside the D-row weights

# packed vector slab: rows 0:16 = (16,16) additive score mask, then 8 parameter rows
R_BQKV, R_LN1A, R_LN1B, R_LN2A, R_LN2B, R_BO, R_B2, R_B1 = (
    BS, BS + 1, BS + 2, BS + 3, BS + 4, BS + 5, BS + 6, BS + 7)
VPACK_H, VPACK_W = BS + 8, 128


def encoder_layer_kernel(x_ref, wpack_ref, vpack_ref, o_ref):
    x = x_ref[...]                                   # (BS, D) = (16, 32)
    scale = 1.0 / math.sqrt(DK)

    # ---- unpack packed parameters (static, lane/sublane-aligned slices) ----
    amask = vpack_ref[0:BS, 0:BS]                    # (16,16) additive mask (0 / -1e9)
    b_qkv = vpack_ref[R_BQKV:R_BQKV + 1, 0:3 * D]    # (1, 96)
    ln1_a = vpack_ref[R_LN1A:R_LN1A + 1, 0:D]
    ln1_b = vpack_ref[R_LN1B:R_LN1B + 1, 0:D]
    ln2_a = vpack_ref[R_LN2A:R_LN2A + 1, 0:D]
    ln2_b = vpack_ref[R_LN2B:R_LN2B + 1, 0:D]
    bo    = vpack_ref[R_BO:R_BO + 1, 0:D]
    b2    = vpack_ref[R_B2:R_B2 + 1, 0:D]
    b1    = vpack_ref[R_B1:R_B1 + 1, 0:FF]

    w_qkv = wpack_ref[0:D, WQKV_OFF:WQKV_OFF + 3 * D]   # (32, 96)  @ lane 0
    wo    = wpack_ref[0:D, WO_OFF:WO_OFF + D]           # (32, 32)  @ lane 128
    w1    = wpack_ref[0:D, W1_OFF:W1_OFF + FF]          # (32, 64)  @ lane 256
    w2    = wpack_ref[:, W2_OFF:W2_OFF + D]             # (64, 32)  @ lane 384

    def layer_norm(z, a, b):
        mean = jnp.mean(z, axis=-1, keepdims=True)
        diff = z - mean
        # torch.Tensor.std is unbiased: divide by (N - 1)
        var = jnp.sum(diff * diff, axis=-1, keepdims=True) / (D - 1)
        std = jnp.sqrt(var)
        return a * diff / (std + EPS) + b

    # ---- sublayer 0: multi-head self-attention with residual ----
    xn = layer_norm(x, ln1_a, ln1_b)
    qkv = jnp.dot(xn, w_qkv, preferred_element_type=jnp.float32) + b_qkv    # fused QKV (16, 96)
    q = qkv[:, 0:D] * scale                          # 1/sqrt(dk) folded into q once
    k = qkv[:, D:2 * D]
    v = qkv[:, 2 * D:3 * D]

    attn_proj = None
    for h in range(H):                               # static unroll (H=4), batches merged
        cs = h * DK
        qh, kh, vh = q[:, cs:cs + DK], k[:, cs:cs + DK], v[:, cs:cs + DK]
        s = lax.dot_general(qh, kh, (((1,), (1,)), ((), ())),
                            preferred_element_type=jnp.float32)             # (16,16) both batches
        s = s + amask                                # cross-batch + padding masked additively
        s = s - jnp.max(s, axis=-1, keepdims=True)
        p = jnp.exp(s)
        p = p * pl.reciprocal(jnp.sum(p, axis=-1, keepdims=True), approx=True)
        head_out = jnp.dot(p, vh, preferred_element_type=jnp.float32)       # (16, 8)
        # accumulate straight through Wo (sublane-aligned 8-row slice): no VMEM scratch,
        # no partial stores, no reload.
        contrib = jnp.dot(head_out, wo[cs:cs + DK, :],
                          preferred_element_type=jnp.float32)               # (16, 32)
        attn_proj = contrib if attn_proj is None else attn_proj + contrib

    x1 = x + attn_proj + bo                          # dropout == identity at inference

    # ---- sublayer 1: position-wise feed-forward with residual ----
    xn2 = layer_norm(x1, ln2_a, ln2_b)
    hdn = jnp.maximum(jnp.dot(xn2, w1, preferred_element_type=jnp.float32) + b1, 0.0)
    ffn = jnp.dot(hdn, w2, preferred_element_type=jnp.float32) + b2

    o_ref[...] = x1 + ffn


def _full_spec(shape):
    nd = len(shape)
    return pl.BlockSpec(shape, lambda i, _nd=nd: (0,) * _nd)


def _pack_inputs(mask, params):
    """Wrapper-side packing into 2 DMA-friendly slabs (plus x): weights + vectors/mask."""
    wpack = jnp.zeros((WPACK_H, WPACK_W), jnp.float32)
    wpack = wpack.at[0:D, WQKV_OFF:WQKV_OFF + 3 * D].set(
        jnp.concatenate([params["wq"], params["wk"], params["wv"]], axis=1))
    wpack = wpack.at[0:D, WO_OFF:WO_OFF + D].set(params["wo"])
    wpack = wpack.at[0:D, W1_OFF:W1_OFF + FF].set(params["w1"])
    wpack = wpack.at[:, W2_OFF:W2_OFF + D].set(params["w2"])

    # additive score mask over the merged (B*S, B*S) score matrix:
    #   0      if same batch and key position visible
    #  -1e9    for cross-batch blocks or padded keys
    key_mask = mask.reshape(B, S)
    bidx = jnp.arange(BS) // S
    attendable = (bidx[:, None] == bidx[None, :]) & (key_mask.reshape(BS)[None, :] > 0.0)
    amask = jnp.where(attendable, 0.0, -1e9).astype(jnp.float32)

    def row(vec):
        vec = vec.reshape(1, -1)
        return jnp.pad(vec, ((0, 0), (0, VPACK_W - vec.shape[1])))

    vpack = jnp.concatenate([
        jnp.pad(amask, ((0, 0), (0, VPACK_W - BS))),                     # rows 0:16
        row(jnp.concatenate([params["bq"], params["bk"], params["bv"]], axis=-1)),
        row(params["ln1_a"]), row(params["ln1_b"]),
        row(params["ln2_a"]), row(params["ln2_b"]),
        row(params["bo"]), row(params["b2"]), row(params["b1"]),
    ], axis=0)                                                           # (24, 128)
    return wpack, vpack


def encoder_layer(x, mask, params):
    wpack, vpack = _pack_inputs(mask, params)
    x_flat = x.reshape(BS, D)                        # both batches in one kernel invocation

    out = pl.pallas_call(
        encoder_layer_kernel,
        out_shape=jax.ShapeDtypeStruct((BS, D), jnp.float32),
        grid_spec=pltpu.PrefetchScalarGridSpec(
            num_scalar_prefetch=0,
            grid=(1,),                               # single step: no per-row grid overhead
            in_specs=[_full_spec((BS, D)),
                      _full_spec((WPACK_H, WPACK_W)),
                      _full_spec((VPACK_H, VPACK_W))],
            out_specs=_full_spec((BS, D)),
        ),
        compiler_params=pltpu.CompilerParams(dimension_semantics=("arbitrary",)),
    )(x_flat, wpack, vpack)
    # Output last dim is 32 lanes (masked stores): negligible at 2 KiB; becomes worth a
    # lane-dense relayout only once the kernel amortizes many more tokens per call.
    return out.reshape(B, S, D)


def reference(x, mask, p):
    """Pure-JAX reference matching the PyTorch forward semantics."""
    def ln(z, a, b):
        mean = z.mean(-1, keepdims=True)
        diff = z - mean
        std = jnp.sqrt(jnp.sum(diff * diff, -1, keepdims=True) / (z.shape[-1] - 1))
        return a * diff / (std + EPS) + b

    xn = ln(x, p["ln1_a"], p["ln1_b"])
    q = xn @ p["wq"] + p["bq"]
    k = xn @ p["wk"] + p["bk"]
    v = xn @ p["wv"] + p["bv"]

    def split(t):
        return t.reshape(B, S, H, DK).transpose(0, 2, 1, 3)

    qh, kh, vh = split(q), split(k), split(v)
    scores = jnp.einsum("bhqd,bhkd->bhqk", qh, kh) / math.sqrt(DK)
    scores = jnp.where(mask[:, None, :, :] == 0.0, -1e9, scores)
    pattn = jax.nn.softmax(scores, axis=-1)
    attn = jnp.einsum("bhqk,bhkd->bhqd", pattn, vh).transpose(0, 2, 1, 3).reshape(B, S, D)
    attn = attn @ p["wo"] + p["bo"]
    x1 = x + attn

    xn2 = ln(x1, p["ln2_a"], p["ln2_b"])
    ffn = jnp.maximum(xn2 @ p["w1"] + p["b1"], 0.0) @ p["w2"] + p["b2"]
    return x1 + ffn


def init_params(key):
    keys = jax.random.split(key, 8)
    s = 0.02
    return {
        "ln1_a": jnp.ones((1, D), jnp.float32),
        "ln1_b": jnp.zeros((1, D), jnp.float32),
        "wq": s * jax.random.normal(keys[0], (D, D), jnp.float32),
        "bq": jnp.zeros((1, D), jnp.float32),
        "wk": s * jax.random.normal(keys[1], (D, D), jnp.float32),
        "bk": jnp.zeros((1, D), jnp.float32),
        "wv": s * jax.random.normal(keys[2], (D, D), jnp.float32),
        "bv": jnp.zeros((1, D), jnp.float32),
        "wo": s * jax.random.normal(keys[3], (D, D), jnp.float32),
        "bo": jnp.zeros((1, D), jnp.float32),
        "ln2_a": jnp.ones((1, D), jnp.float32),
        "ln2_b": jnp.zeros((1, D), jnp.float32),
        "w1": s * jax.random.normal(keys[4], (D, FF), jnp.float32),
        "b1": jnp.zeros((1, FF), jnp.float32),
        "w2": s * jax.random.normal(keys[5], (FF, D), jnp.float32),
        "b2": jnp.zeros((1, D), jnp.float32),
    }


if __name__ == "__main__":
    key = jax.random.PRNGKey(0)
    k_p, k_x = jax.random.split(key)
    params = init_params(k_p)

    x = jax.random.normal(k_x, (B, S, D), jnp.float32)
    # mask: batch 0 fully visible, batch 1 has last 2 positions masked out
    mask = jnp.ones((B, 1, S), jnp.float32).at[1, 0, 6:].set(0.0)

    out = encoder_layer(x, mask, params)
    out = jax.block_until_ready(out)

    ref = reference(x, mask, params)
    assert out.shape == (B, S, D)
    assert jnp.allclose(out, ref, atol=1e-4, rtol=1e-4), "mismatch vs reference"

    print("KERNEL_OK")
</pallas_src>

<mosaic_0001>
module attributes {stable_mosaic.version = 11 : i64} {
  func.func @encoder_layer_kernel(%arg0: i32, %arg1: memref<16x32xf32, #tpu.memory_space<vmem>>, %arg2: memref<64x512xf32, #tpu.memory_space<vmem>>, %arg3: memref<24x128xf32, #tpu.memory_space<vmem>>, %arg4: memref<16x32xf32, #tpu.memory_space<vmem>>) attributes {dimension_semantics = [#tpu.dimension_semantics<arbitrary>], iteration_bounds = array<i64: 1>, scalar_prefetch = 0 : i64, scratch_operands = 0 : i64, tpu.core_type = #tpu.core_type<tc>, window_params = [{pipeline_mode = #tpu.pipeline_mode<synchronous>, transform_indices = @transform_0, window_bounds = array<i64: 16, 32>}, {pipeline_mode = #tpu.pipeline_mode<synchronous>, transform_indices = @transform_1, window_bounds = array<i64: 64, 512>}, {pipeline_mode = #tpu.pipeline_mode<synchronous>, transform_indices = @transform_2, window_bounds = array<i64: 24, 128>}, {pipeline_mode = #tpu.pipeline_mode<synchronous>, transform_indices = @transform_3, window_bounds = array<i64: 16, 32>}]} {
    %c0 = arith.constant 0 : index
    %c0_0 = arith.constant 0 : index
    %0 = vector.load %arg1[%c0, %c0_0] : memref<16x32xf32, #tpu.memory_space<vmem>>, vector<16x32xf32>
    %c0_1 = arith.constant 0 : index
    %c0_2 = arith.constant 0 : index
    %1 = vector.load %arg3[%c0_1, %c0_2] : memref<24x128xf32, #tpu.memory_space<vmem>>, vector<16x16xf32>
    %c16 = arith.constant 16 : index
    %c0_3 = arith.constant 0 : index
    %2 = vector.load %arg3[%c16, %c0_3] : memref<24x128xf32, #tpu.memory_space<vmem>>, vector<1x96xf32>
    %c17 = arith.constant 17 : index
    %c0_4 = arith.constant 0 : index
    %3 = vector.load %arg3[%c17, %c0_4] : memref<24x128xf32, #tpu.memory_space<vmem>>, vector<1x32xf32>
    %c18 = arith.constant 18 : index
    %c0_5 = arith.constant 0 : index
    %4 = vector.load %arg3[%c18, %c0_5] : memref<24x128xf32, #tpu.memory_space<vmem>>, vector<1x32xf32>
    %c19 = arith.constant 19 : index
    %c0_6 = arith.constant 0 : index
    %5 = vector.load %arg3[%c19, %c0_6] : memref<24x128xf32, #tpu.memory_space<vmem>>, vector<1x32xf32>
    %c20 = arith.constant 20 : index
    %c0_7 = arith.constant 0 : index
    %6 = vector.load %arg3[%c20, %c0_7] : memref<24x128xf32, #tpu.memory_space<vmem>>, vector<1x32xf32>
    %c21 = arith.constant 21 : index
    %c0_8 = arith.constant 0 : index
    %7 = vector.load %arg3[%c21, %c0_8] : memref<24x128xf32, #tpu.memory_space<vmem>>, vector<1x32xf32>
    %c22 = arith.constant 22 : index
    %c0_9 = arith.constant 0 : index
    %8 = vector.load %arg3[%c22, %c0_9] : memref<24x128xf32, #tpu.memory_space<vmem>>, vector<1x32xf32>
    %c23 = arith.constant 23 : index
    %c0_10 = arith.constant 0 : index
    %9 = vector.load %arg3[%c23, %c0_10] : memref<24x128xf32, #tpu.memory_space<vmem>>, vector<1x64xf32>
    %c0_11 = arith.constant 0 : index
    %c0_12 = arith.constant 0 : index
    %10 = vector.load %arg2[%c0_11, %c0_12] : memref<64x512xf32, #tpu.memory_space<vmem>>, vector<32x96xf32>
    %c0_13 = arith.constant 0 : index
    %c128 = arith.constant 128 : index
    %11 = vector.load %arg2[%c0_13, %c128] : memref<64x512xf32, #tpu.memory_space<vmem>>, vector<32x32xf32>
    %c0_14 = arith.constant 0 : index
    %c256 = arith.constant 256 : index
    %12 = vector.load %arg2[%c0_14, %c256] : memref<64x512xf32, #tpu.memory_space<vmem>>, vector<32x64xf32>
    %c0_15 = arith.constant 0 : index
    %c384 = arith.constant 384 : index
    %13 = vector.load %arg2[%c0_15, %c384] : memref<64x512xf32, #tpu.memory_space<vmem>>, vector<64x32xf32>
    %cst = arith.constant dense<0.000000e+00> : vector<16xf32>
    %14 = vector.multi_reduction <add>, %0, %cst [1] : vector<16x32xf32> to vector<16xf32>
    %15 = vector.shape_cast %14 : vector<16xf32> to vector<16x1xf32>
    %cst_16 = arith.constant 3.200000e+01 : f32
    %16 = vector.broadcast %cst_16 : f32 to vector<16x1xf32>
    %17 = arith.divf %15, %16 : vector<16x1xf32>
    %18 = vector.broadcast %17 : vector<16x1xf32> to vector<16x32xf32>
    %19 = arith.subf %0, %18 : vector<16x32xf32>
    %20 = arith.mulf %19, %19 : vector<16x32xf32>
    %cst_17 = arith.constant dense<0.000000e+00> : vector<16xf32>
    %21 = vector.multi_reduction <add>, %20, %cst_17 [1] : vector<16x32xf32> to vector<16xf32>
    %22 = vector.shape_cast %21 : vector<16xf32> to vector<16x1xf32>
    %cst_18 = arith.constant 3.100000e+01 : f32
    %23 = vector.broadcast %cst_18 : f32 to vector<16x1xf32>
    %24 = arith.divf %22, %23 : vector<16x1xf32>
    %25 = math.sqrt %24 : vector<16x1xf32>
    %26 = vector.broadcast %3 : vector<1x32xf32> to vector<16x32xf32>
    %27 = arith.mulf %26, %19 : vector<16x32xf32>
    %cst_19 = arith.constant 9.99999997E-7 : f32
    %28 = vector.broadcast %cst_19 : f32 to vector<16x1xf32>
    %29 = arith.addf %25, %28 : vector<16x1xf32>
    %30 = vector.broadcast %29 : vector<16x1xf32> to vector<16x32xf32>
    %31 = arith.divf %27, %30 : vector<16x32xf32>
    %32 = vector.broadcast %4 : vector<1x32xf32> to vector<16x32xf32>
    %33 = arith.addf %31, %32 : vector<16x32xf32>
    %cst_20 = arith.constant dense<0.000000e+00> : vector<16x96xf32>
    %34 = tpu.matmul %33, %10, %cst_20 {dimension_numbers = #tpu.dot_dimension_numbers<[1], [0], [0], [1], [0, 0, 1, 1], [], []>} : vector<16x32xf32>, vector<32x96xf32>, vector<16x96xf32> -> vector<16x96xf32>
    %35 = vector.broadcast %2 : vector<1x96xf32> to vector<16x96xf32>
    %36 = arith.addf %34, %35 : vector<16x96xf32>
    %37 = vector.extract_strided_slice %36 {offsets = [0, 0], sizes = [16, 32], strides = [1, 1]} : vector<16x96xf32> to vector<16x32xf32>
    %cst_21 = arith.constant 0.353553385 : f32
    %38 = vector.broadcast %cst_21 : f32 to vector<16x32xf32>
    %39 = arith.mulf %37, %38 : vector<16x32xf32>
    %40 = vector.extract_strided_slice %36 {offsets = [0, 32], sizes = [16, 32], strides = [1, 1]} : vector<16x96xf32> to vector<16x32xf32>
    %41 = vector.extract_strided_slice %36 {offsets = [0, 64], sizes = [16, 32], strides = [1, 1]} : vector<16x96xf32> to vector<16x32xf32>
    %42 = vector.extract_strided_slice %39 {offsets = [0, 0], sizes = [16, 8], strides = [1, 1]} : vector<16x32xf32> to vector<16x8xf32>
    %43 = vector.extract_strided_slice %40 {offsets = [0, 0], sizes = [16, 8], strides = [1, 1]} : vector<16x32xf32> to vector<16x8xf32>
    %44 = vector.extract_strided_slice %41 {offsets = [0, 0], sizes = [16, 8], strides = [1, 1]} : vector<16x32xf32> to vector<16x8xf32>
    %cst_22 = arith.constant dense<0.000000e+00> : vector<16x16xf32>
    %45 = tpu.matmul %42, %43, %cst_22 {dimension_numbers = #tpu.dot_dimension_numbers<[1], [1], [0], [0], [0, 0, 1, 0], [], []>} : vector<16x8xf32>, vector<16x8xf32>, vector<16x16xf32> -> vector<16x16xf32>
    %46 = arith.addf %45, %1 : vector<16x16xf32>
    %cst_23 = arith.constant dense<0xFF800000> : vector<16xf32>
    %47 = vector.multi_reduction <maximumf>, %46, %cst_23 [1] : vector<16x16xf32> to vector<16xf32>
    %48 = vector.shape_cast %47 : vector<16xf32> to vector<16x1xf32>
    %49 = vector.broadcast %48 : vector<16x1xf32> to vector<16x16xf32>
    %50 = arith.subf %46, %49 : vector<16x16xf32>
    %51 = math.exp %50 : vector<16x16xf32>
    %cst_24 = arith.constant dense<0.000000e+00> : vector<16xf32>
    %52 = vector.multi_reduction <add>, %51, %cst_24 [1] : vector<16x16xf32> to vector<16xf32>
    %53 = vector.shape_cast %52 : vector<16xf32> to vector<16x1xf32>
    %54 = tpu.reciprocal %53 {approx = true} : vector<16x1xf32> -> vector<16x1xf32>
    %55 = vector.broadcast %54 : vector<16x1xf32> to vector<16x16xf32>
    %56 = arith.mulf %51, %55 : vector<16x16xf32>
    %cst_25 = arith.constant dense<0.000000e+00> : vector<16x8xf32>
    %57 = tpu.matmul %56, %44, %cst_25 {dimension_numbers = #tpu.dot_dimension_numbers<[1], [0], [0], [1], [0, 0, 1, 1], [], []>} : vector<16x16xf32>, vector<16x8xf32>, vector<16x8xf32> -> vector<16x8xf32>
    %58 = vector.extract_strided_slice %11 {offsets = [0, 0], sizes = [8, 32], strides = [1, 1]} : vector<32x32xf32> to vector<8x32xf32>
    %cst_26 = arith.constant dense<0.000000e+00> : vector<16x32xf32>
    %59 = tpu.matmul %57, %58, %cst_26 {dimension_numbers = #tpu.dot_dimension_numbers<[1], [0], [0], [1], [0, 0, 1, 1], [], []>} : vector<16x8xf32>, vector<8x32xf32>, vector<16x32xf32> -> vector<16x32xf32>
    %60 = vector.extract_strided_slice %39 {offsets = [0, 8], sizes = [16, 8], strides = [1, 1]} : vector<16x32xf32> to vector<16x8xf32>
    %61 = vector.extract_strided_slice %40 {offsets = [0, 8], sizes = [16, 8], strides = [1, 1]} : vector<16x32xf32> to vector<16x8xf32>
    %62 = vector.extract_strided_slice %41 {offsets = [0, 8], sizes = [16, 8], strides = [1, 1]} : vector<16x32xf32> to vector<16x8xf32>
    %cst_27 = arith.constant dense<0.000000e+00> : vector<16x16xf32>
    %63 = tpu.matmul %60, %61, %cst_27 {dimension_numbers = #tpu.dot_dimension_numbers<[1], [1], [0], [0], [0, 0, 1, 0], [], []>} : vector<16x8xf32>, vector<16x8xf32>, vector<16x16xf32> -> vector<16x16xf32>
    %64 = arith.addf %63, %1 : vector<16x16xf32>
    %cst_28 = arith.constant dense<0xFF800000> : vector<16xf32>
    %65 = vector.multi_reduction <maximumf>, %64, %cst_28 [1] : vector<16x16xf32> to vector<16xf32>
    %66 = vector.shape_cast %65 : vector<16xf32> to vector<16x1xf32>
    %67 = vector.broadcast %66 : vector<16x1xf32> to vector<16x16xf32>
    %68 = arith.subf %64, %67 : vector<16x16xf32>
    %69 = math.exp %68 : vector<16x16xf32>
    %cst_29 = arith.constant dense<0.000000e+00> : vector<16xf32>
    %70 = vector.multi_reduction <add>, %69, %cst_29 [1] : vector<16x16xf32> to vector<16xf32>
    %71 = vector.shape_cast %70 : vector<16xf32> to vector<16x1xf32>
    %72 = tpu.reciprocal %71 {approx = true} : vector<16x1xf32> -> vector<16x1xf32>
    %73 = vector.broadcast %72 : vector<16x1xf32> to vector<16x16xf32>
    %74 = arith.mulf %69, %73 : vector<16x16xf32>
    %cst_30 = arith.constant dense<0.000000e+00> : vector<16x8xf32>
    %75 = tpu.matmul %74, %62, %cst_30 {dimension_numbers = #tpu.dot_dimension_numbers<[1], [0], [0], [1], [0, 0, 1, 1], [], []>} : vector<16x16xf32>, vector<16x8xf32>, vector<16x8xf32> -> vector<16x8xf32>
    %76 = vector.extract_strided_slice %11 {offsets = [8, 0], sizes = [8, 32], strides = [1, 1]} : vector<32x32xf32> to vector<8x32xf32>
    %cst_31 = arith.constant dense<0.000000e+00> : vector<16x32xf32>
    %77 = tpu.matmul %75, %76, %cst_31 {dimension_numbers = #tpu.dot_dimension_numbers<[1], [0], [0], [1], [0, 0, 1, 1], [], []>} : vector<16x8xf32>, vector<8x32xf32>, vector<16x32xf32> -> vector<16x32xf32>
    %78 = arith.addf %59, %77 : vector<16x32xf32>
    %79 = vector.extract_strided_slice %39 {offsets = [0, 16], sizes = [16, 8], strides = [1, 1]} : vector<16x32xf32> to vector<16x8xf32>
    %80 = vector.extract_strided_slice %40 {offsets = [0, 16], sizes = [16, 8], strides = [1, 1]} : vector<16x32xf32> to vector<16x8xf32>
    %81 = vector.extract_strided_slice %41 {offsets = [0, 16], sizes = [16, 8], strides = [1, 1]} : vector<16x32xf32> to vector<16x8xf32>
    %cst_32 = arith.constant dense<0.000000e+00> : vector<16x16xf32>
    %82 = tpu.matmul %79, %80, %cst_32 {dimension_numbers = #tpu.dot_dimension_numbers<[1], [1], [0], [0], [0, 0, 1, 0], [], []>} : vector<16x8xf32>, vector<16x8xf32>, vector<16x16xf32> -> vector<16x16xf32>
    %83 = arith.addf %82, %1 : vector<16x16xf32>
    %cst_33 = arith.constant dense<0xFF800000> : vector<16xf32>
    %84 = vector.multi_reduction <maximumf>, %83, %cst_33 [1] : vector<16x16xf32> to vector<16xf32>
    %85 = vector.shape_cast %84 : vector<16xf32> to vector<16x1xf32>
    %86 = vector.broadcast %85 : vector<16x1xf32> to vector<16x16xf32>
    %87 = arith.subf %83, %86 : vector<16x16xf32>
    %88 = math.exp %87 : vector<16x16xf32>
    %cst_34 = arith.constant dense<0.000000e+00> : vector<16xf32>
    %89 = vector.multi_reduction <add>, %88, %cst_34 [1] : vector<16x16xf32> to vector<16xf32>
    %90 = vector.shape_cast %89 : vector<16xf32> to vector<16x1xf32>
    %91 = tpu.reciprocal %90 {approx = true} : vector<16x1xf32> -> vector<16x1xf32>
    %92 = vector.broadcast %91 : vector<16x1xf32> to vector<16x16xf32>
    %93 = arith.mulf %88, %92 : vector<16x16xf32>
    %cst_35 = arith.constant dense<0.000000e+00> : vector<16x8xf32>
    %94 = tpu.matmul %93, %81, %cst_35 {dimension_numbers = #tpu.dot_dimension_numbers<[1], [0], [0], [1], [0, 0, 1, 1], [], []>} : vector<16x16xf32>, vector<16x8xf32>, vector<16x8xf32> -> vector<16x8xf32>
    %95 = vector.extract_strided_slice %11 {offsets = [16, 0], sizes = [8, 32], strides = [1, 1]} : vector<32x32xf32> to vector<8x32xf32>
    %cst_36 = arith.constant dense<0.000000e+00> : vector<16x32xf32>
    %96 = tpu.matmul %94, %95, %cst_36 {dimension_numbers = #tpu.dot_dimension_numbers<[1], [0], [0], [1], [0, 0, 1, 1], [], []>} : vector<16x8xf32>, vector<8x32xf32>, vector<16x32xf32> -> vector<16x32xf32>
    %97 = arith.addf %78, %96 : vector<16x32xf32>
    %98 = vector.extract_strided_slice %39 {offsets = [0, 24], sizes = [16, 8], strides = [1, 1]} : vector<16x32xf32> to vector<16x8xf32>
    %99 = vector.extract_strided_slice %40 {offsets = [0, 24], sizes = [16, 8], strides = [1, 1]} : vector<16x32xf32> to vector<16x8xf32>
    %100 = vector.extract_strided_slice %41 {offsets = [0, 24], sizes = [16, 8], strides = [1, 1]} : vector<16x32xf32> to vector<16x8xf32>
    %cst_37 = arith.constant dense<0.000000e+00> : vector<16x16xf32>
    %101 = tpu.matmul %98, %99, %cst_37 {dimension_numbers = #tpu.dot_dimension_numbers<[1], [1], [0], [0], [0, 0, 1, 0], [], []>} : vector<16x8xf32>, vector<16x8xf32>, vector<16x16xf32> -> vector<16x16xf32>
    %102 = arith.addf %101, %1 : vector<16x16xf32>
    %cst_38 = arith.constant dense<0xFF800000> : vector<16xf32>
    %103 = vector.multi_reduction <maximumf>, %102, %cst_38 [1] : vector<16x16xf32> to vector<16xf32>
    %104 = vector.shape_cast %103 : vector<16xf32> to vector<16x1xf32>
    %105 = vector.broadcast %104 : vector<16x1xf32> to vector<16x16xf32>
    %106 = arith.subf %102, %105 : vector<16x16xf32>
    %107 = math.exp %106 : vector<16x16xf32>
    %cst_39 = arith.constant dense<0.000000e+00> : vector<16xf32>
    %108 = vector.multi_reduction <add>, %107, %cst_39 [1] : vector<16x16xf32> to vector<16xf32>
    %109 = vector.shape_cast %108 : vector<16xf32> to vector<16x1xf32>
    %110 = tpu.reciprocal %109 {approx = true} : vector<16x1xf32> -> vector<16x1xf32>
    %111 = vector.broadcast %110 : vector<16x1xf32> to vector<16x16xf32>
    %112 = arith.mulf %107, %111 : vector<16x16xf32>
    %cst_40 = arith.constant dense<0.000000e+00> : vector<16x8xf32>
    %113 = tpu.matmul %112, %100, %cst_40 {dimension_numbers = #tpu.dot_dimension_numbers<[1], [0], [0], [1], [0, 0, 1, 1], [], []>} : vector<16x16xf32>, vector<16x8xf32>, vector<16x8xf32> -> vector<16x8xf32>
    %114 = vector.extract_strided_slice %11 {offsets = [24, 0], sizes = [8, 32], strides = [1, 1]} : vector<32x32xf32> to vector<8x32xf32>
    %cst_41 = arith.constant dense<0.000000e+00> : vector<16x32xf32>
    %115 = tpu.matmul %113, %114, %cst_41 {dimension_numbers = #tpu.dot_dimension_numbers<[1], [0], [0], [1], [0, 0, 1, 1], [], []>} : vector<16x8xf32>, vector<8x32xf32>, vector<16x32xf32> -> vector<16x32xf32>
    %116 = arith.addf %97, %115 : vector<16x32xf32>
    %117 = arith.addf %0, %116 : vector<16x32xf32>
    %118 = vector.broadcast %7 : vector<1x32xf32> to vector<16x32xf32>
    %119 = arith.addf %117, %118 : vector<16x32xf32>
    %cst_42 = arith.constant dense<0.000000e+00> : vector<16xf32>
    %120 = vector.multi_reduction <add>, %119, %cst_42 [1] : vector<16x32xf32> to vector<16xf32>
    %121 = vector.shape_cast %120 : vector<16xf32> to vector<16x1xf32>
    %cst_43 = arith.constant 3.200000e+01 : f32
    %122 = vector.broadcast %cst_43 : f32 to vector<16x1xf32>
    %123 = arith.divf %121, %122 : vector<16x1xf32>
    %124 = vector.broadcast %123 : vector<16x1xf32> to vector<16x32xf32>
    %125 = arith.subf %119, %124 : vector<16x32xf32>
    %126 = arith.mulf %125, %125 : vector<16x32xf32>
    %cst_44 = arith.constant dense<0.000000e+00> : vector<16xf32>
    %127 = vector.multi_reduction <add>, %126, %cst_44 [1] : vector<16x32xf32> to vector<16xf32>
    %128 = vector.shape_cast %127 : vector<16xf32> to vector<16x1xf32>
    %cst_45 = arith.constant 3.100000e+01 : f32
    %129 = vector.broadcast %cst_45 : f32 to vector<16x1xf32>
    %130 = arith.divf %128, %129 : vector<16x1xf32>
    %131 = math.sqrt %130 : vector<16x1xf32>
    %132 = vector.broadcast %5 : vector<1x32xf32> to vector<16x32xf32>
    %133 = arith.mulf %132, %125 : vector<16x32xf32>
    %cst_46 = arith.constant 9.99999997E-7 : f32
    %134 = vector.broadcast %cst_46 : f32 to vector<16x1xf32>
    %135 = arith.addf %131, %134 : vector<16x1xf32>
    %136 = vector.broadcast %135 : vector<16x1xf32> to vector<16x32xf32>
    %137 = arith.divf %133, %136 : vector<16x32xf32>
    %138 = vector.broadcast %6 : vector<1x32xf32> to vector<16x32xf32>
    %139 = arith.addf %137, %138 : vector<16x32xf32>
    %cst_47 = arith.constant dense<0.000000e+00> : vector<16x64xf32>
    %140 = tpu.matmul %139, %12, %cst_47 {dimension_numbers = #tpu.dot_dimension_numbers<[1], [0], [0], [1], [0, 0, 1, 1], [], []>} : vector<16x32xf32>, vector<32x64xf32>, vector<16x64xf32> -> vector<16x64xf32>
    %141 = vector.broadcast %9 : vector<1x64xf32> to vector<16x64xf32>
    %142 = arith.addf %140, %141 : vector<16x64xf32>
    %cst_48 = arith.constant 0.000000e+00 : f32
    %143 = vector.broadcast %cst_48 : f32 to vector<16x64xf32>
    %144 = arith.maximumf %142, %143 : vector<16x64xf32>
    %cst_49 = arith.constant dense<0.000000e+00> : vector<16x32xf32>
    %145 = tpu.matmul %144, %13, %cst_49 {dimension_numbers = #tpu.dot_dimension_numbers<[1], [0], [0], [1], [0, 0, 1, 1], [], []>} : vector<16x64xf32>, vector<64x32xf32>, vector<16x32xf32> -> vector<16x32xf32>
    %146 = vector.broadcast %8 : vector<1x32xf32> to vector<16x32xf32>
    %147 = arith.addf %145, %146 : vector<16x32xf32>
    %148 = arith.addf %119, %147 : vector<16x32xf32>
    %c0_50 = arith.constant 0 : index
    %c0_51 = arith.constant 0 : index
    %149 = vector.load %arg4[%c0_50, %c0_51] : memref<16x32xf32, #tpu.memory_space<vmem>>, vector<16x32xf32>
    tpu.vector_store %arg4[%c0_50, %c0_51], %148 {strides = array<i32>} : memref<16x32xf32, #tpu.memory_space<vmem>>, vector<16x32xf32>,
    return
  }
  func.func @transform_0(%arg0: i32) -> (i32, i32) {
    %c0_i32 = arith.constant 0 : i32
    %c0_i32_0 = arith.constant 0 : i32
    %c0_i32_1 = arith.constant 0 : i32
    return %c0_i32, %c0_i32_0 : i32, i32
  }
  func.func @transform_1(%arg0: i32) -> (i32, i32) {
    %c0_i32 = arith.constant 0 : i32
    %c0_i32_0 = arith.constant 0 : i32
    %c0_i32_1 = arith.constant 0 : i32
    return %c0_i32, %c0_i32_0 : i32, i32
  }
  func.func @transform_2(%arg0: i32) -> (i32, i32) {
    %c0_i32 = arith.constant 0 : i32
    %c0_i32_0 = arith.constant 0 : i32
    %c0_i32_1 = arith.constant 0 : i32
    return %c0_i32, %c0_i32_0 : i32, i32
  }
  func.func @transform_3(%arg0: i32) -> (i32, i32) {
    %c0_i32 = arith.constant 0 : i32
    %c0_i32_0 = arith.constant 0 : i32
    %c0_i32_1 = arith.constant 0 : i32
    return %c0_i32, %c0_i32_0 : i32, i32
  }
}

</mosaic_0001>

<bundles_post_ra>
// kernel: tpu_custom_call.1
= control target key start
LH: loop header
LB: loop body
LE: loop exit
PB: predicated region body
PF: predicated region fallthrough
CT: control target
= control target key end

     0   :  { %8 = vsyncpa [#allocation3], 0  ;;  %s2349_s0 = inlined_call_operand.hbm [shape: f32[16,32], index: 0, kind: input, shape index: {}]   ;;  %s2350_s1 = inlined_call_operand.hbm [shape: f32[64,512], index: 1, kind: input, shape index: {}]   ;;  %s2351_s2 = inlined_call_operand.hbm [shape: f32[24,128], index: 2, kind: input, shape index: {}]   ;;  %s2352_s3 = inlined_call_operand.hbm [shape: f32[16,32], index: 3, kind: output, shape index: {}]  }
   0x1   :  { %9 = vsyncpa [#allocation6], 0 }
   0x2   :  { %10 = vsyncpa [#allocation4], 0  ;;  %s2123_s12 = smov [#allocation5]   ;;  %s2029_s16 = scalar_lea.hbm %s2350_s1, 4096 }
   0x3   :  { %s28_s13 = sshll.u32 %s2123_s12, 4  ;;  %p2030_p0 = scmp.ne.s32.totalorder %s2350_s1, %s2029_s16  ;;  %s29_s13 = int_to_ptr.vmem [resolvable:$true] %s28_s13 }
   0x4   :  { %p2033_p1 = scmp.lt.u32.totalorder %s2029_s16, %s2350_s1 }
   0x6   :  { %p2035_p2 = pnand %p2033_p1, %p2030_p0 }
   0x8   :  { %2038 = shalt.err (!%p2035_p2)
}
   0x9   :  { %s2039_s21 = scalar_lea.vmem %s29_s13, 4096  ;;  %p2044_p4 = scmp.lt.s32.totalorder %s29_s13, %s29_s13 }
   0xa   :  { %p2040_p3 = scmp.ne.s32.totalorder %s29_s13, %s2039_s21  ;;  %p2045_p5 = scmp.lt.s32.totalorder %s2039_s21, %s2039_s21 }
   0xc   :  { %p2046_p6 = por %p2045_p5, %p2044_p4 }
   0xe   :  { %p2047_p7 = pnand %p2046_p6, %p2040_p3 }
  0x10   :  { %2050 = shalt.err (!%p2047_p7)
}
  0x11   :  { %s2124_s22 = smov 512   ;;  %s2125_s23 = smov 32  }
  0x12   :  { %34 = dma.hbm_to_vmem [thread:$0]  %s2350_s1, 4096, %s29_s13, [#allocation6], %s2124_s22, %s2124_s22, %s2125_s23  }
  0x13   :  { %s2126_s26 = smov [#allocation2]   ;;  %s2051_s30 = scalar_lea.hbm %s2349_s0, 256 }
  0x14   :  { %s16_s27 = sshll.u32 %s2126_s26, 4  ;;  %p2052_p8 = scmp.ne.s32.totalorder %s2349_s0, %s2051_s30  ;;  %s17_s27 = int_to_ptr.vmem [resolvable:$true] %s16_s27 }
  0x15   :  { %p2055_p9 = scmp.lt.u32.totalorder %s2051_s30, %s2349_s0 }
  0x17   :  { %p2057_p10 = pnand %p2055_p9, %p2052_p8 }
  0x19   :  { %2060 = shalt.err (!%p2057_p10)
}
  0x1a   :  { %s2061_s8 = scalar_lea.vmem %s17_s27, 256  ;;  %p2066_p12 = scmp.lt.s32.totalorder %s17_s27, %s17_s27 }
  0x1b   :  { %p2062_p11 = scmp.ne.s32.totalorder %s17_s27, %s2061_s8  ;;  %p2067_p13 = scmp.lt.s32.totalorder %s2061_s8, %s2061_s8 }
  0x1d   :  { %p2068_p0 = por %p2067_p13, %p2066_p12 }
  0x1f   :  { %p2069_p1 = pnand %p2068_p0, %p2062_p11 }
  0x21   :  { %2072 = shalt.err (!%p2069_p1)
}
  0x22   :  { %s2127_s1 = smov 128   ;;  %s2128_s9 = smov 8  }
  0x23   :  { %22 = dma.hbm_to_vmem [thread:$0]  %s2349_s0, 256, %s17_s27, [#allocation3], %s2127_s1, %s2127_s1, %s2128_s9  }
  0x24   :  { %s2129_s12 = smov [#allocation7]   ;;  %s2073_s16 = scalar_lea.hbm %s2351_s2, 384 }
  0x25   :  { %s40_s13 = sshll.u32 %s2129_s12, 4  ;;  %p2074_p2 = scmp.ne.s32.totalorder %s2351_s2, %s2073_s16  ;;  %s41_s13 = int_to_ptr.vmem [resolvable:$true] %s40_s13 }
  0x26   :  { %p2077_p3 = scmp.lt.u32.totalorder %s2073_s16, %s2351_s2 }
  0x28   :  { %p2079_p4 = pnand %p2077_p3, %p2074_p2 }
  0x2a   :  { %2082 = shalt.err (!%p2079_p4)
}
  0x2b   :  { %s2083_s21 = scalar_lea.vmem %s41_s13, 384  ;;  %p2088_p6 = scmp.lt.s32.totalorder %s41_s13, %s41_s13 }
  0x2c   :  { %p2084_p5 = scmp.ne.s32.totalorder %s41_s13, %s2083_s21  ;;  %p2089_p7 = scmp.lt.s32.totalorder %s2083_s21, %s2083_s21 }
  0x2e   :  { %p2090_p8 = por %p2089_p7, %p2088_p6 }
  0x30   :  { %p2091_p9 = pnand %p2090_p8, %p2084_p5 }
  0x32   :  { %2094 = shalt.err (!%p2091_p9)
}
  0x33   :  { %46 = dma.hbm_to_vmem [thread:$0]  %s2351_s2, 384, %s41_s13, [#allocation6], %s2127_s1, %s2127_s1, %s2128_s9  }
  0x34   :  { %2117 = dma.done.wait [#allocation3], 256  }
  0x35   :  { %2118 = vsyncadd [#allocation3], 4294967040 }
  0x36   :  { %2119 = dma.done.wait [#allocation6], 4480  }
  0x37   :  { %2120 = vsyncadd [#allocation6], 4294962816  ;;  %vm88_vm0 = vcmask 261120   ;;  %v2204_v0 = vld [vmem:[#allocation2] sm:$0xff]  ;;  %v2206_v1 = vld [vmem:[#allocation2 + $0x8] sm:$0xff]  ;;  %vm236_vm5 = vcmask 64512  }
  0x38   :  { %v89_v2 = vsel %vm88_vm0, %v2204_v0, 0.0  ;;  %v92_v3 = vsel %vm88_vm0, %v2206_v1, 0.0  ;;  %v68_v14 = vld [vmem:[#allocation5] sm:$0xff]  ;;  %v1615_v36 = vld [vmem:[#allocation7 + $0x11] ss:$0 sm:$0xff]  ;;  %s2130_s2 = smov 88   ;;  %vm2235_vm6 = vmpackc.low %vm236_vm5, %vm236_vm5 }
  0x39   :  { %90 = vadd.xlane.f32.xlu0 %v89_v2  ;;  %v69_v15 = vld [vmem:[#allocation5 + $0x20] sm:$0xff]  ;;  %v1616_v39 = vld [vmem:[#allocation7 + $0x12] ss:$0 sm:$0xff]  ;;  %v1617_v46 = vld [vmem:[#allocation7 + $0x10] ss:$0 sm:$0xff]  ;;  %s2131_s23 = smov 96  }
  0x3a   :  { %v70_v16 = vld [vmem:[#allocation5 + $0x40] sm:$0xff]  ;;  %v1844_v17 = vpack.c.bf16 %v69_v15, %v68_v14  ;;  %s2132_s24 = smov 80   ;;  %s2133_s25 = smov 120   ;;  %vm322_vm7 = vcmask 130048   ;;  %vm1511_vm12 = vcmask 523264  }
  0x3b   :  { %v71_v18 = vld [vmem:[#allocation5 + $0x60] sm:$0xff]  ;;  %s2134_s26 = smov 112   ;;  %s2135_s27 = smov 64  }
  0x3c   :  { %v1848_v19 = vpack.c.bf16 %v71_v18, %v70_v16  ;;  %1845 = vmatprep.subr.bf16.mxu1 %v1844_v17  ;;  %s2136_s28 = smov 72   ;;  %s2137_s29 = smov 104  }
  0x3d   :  { %93 = vadd.xlane.f32.xlu0 %v92_v3  ;;  %1847 = vmatpush3.bf16.msra.mxu1 %v1844_v17  ;;  %s2138_s30 = smov 56   ;;  %s2139_s4 = smov 48  }
  0x3e   :  { %1849 = vmatprep.subr.bf16.mxu1 %v1848_v19  ;;  %s2140_s5 = smov 40   ;;  %s2141_s6 = smov [#allocation8]  }
  0x3f   :  { %s1602_s7 = sshll.u32 %s2141_s6, 4  ;;  %s1603_s7 = int_to_ptr.vmem [resolvable:$true] %s1602_s7 }
  0x40   :  { %s2095_s8 = scalar_lea.vmem %s1603_s7, 256  ;;  %p2100_p11 = scmp.lt.s32.totalorder %s1603_s7, %s1603_s7 }
  0x41   :  { %1851 = vmatpush3.bf16.msra.mxu1 %v1848_v19  ;;  %p2096_p10 = scmp.ne.s32.totalorder %s1603_s7, %s2095_s8  ;;  %p2101_p12 = scmp.lt.s32.totalorder %s2095_s8, %s2095_s8 }
  0x43   :  { %p2102_p13 = por %p2101_p12, %p2100_p11 }
  0x45   :  { %p2103_p0 = pnand %p2102_p13, %p2096_p10 }
  0xc6   :  { %v91_v4 = vpop.xlane.xlu0 %90 }
  0xc7   :  { %v96_v5 = vmul.f32 0.03125, %v91_v4 }
  0xc9   :  { %v98_v6 = vsub.f32 %v2204_v0, %v96_v5 }
  0xca   :  { %v94_v7 = vpop.xlane.xlu0 %93 }
  0xcb   :  { %v97_v8 = vmul.f32 0.03125, %v94_v7  ;;  %v100_v9 = vmul.f32 %v98_v6, %v98_v6  ;;  %v129_v37 = vmul.f32 %v1615_v36, %v98_v6 }
  0xcd   :  { %v99_v10 = vsub.f32 %v2206_v1, %v97_v8  ;;  %v102_v11 = vsel %vm88_vm0, %v100_v9, 0.0  ;;  %v2257_v9 = vld [vmem:[#allocation7 + $0x8] sm:$0xff] }
  0xce   :  { %103 = vadd.xlane.f32.xlu1 %v102_v11 }
  0xcf   :  { %v101_v12 = vmul.f32 %v99_v10, %v99_v10  ;;  %v130_v41 = vmul.f32 %v1615_v36, %v99_v10  ;;  %v2259_v10 = vld [vmem:[#allocation7] sm:$0xff] }
  0xd1   :  { %v105_v13 = vsel %vm88_vm0, %v101_v12, 0.0 }
  0xd2   :  { %106 = vadd.xlane.f32.xlu1 %v105_v13 }
 0x15b   :  { %v104_v20 = vpop.xlane.xlu1 %103 }
 0x15c   :  { %v109_v21 = vmul.f32 0.032258064, %v104_v20 }
 0x15e   :  { %1981 = vrsqrt.f32 %v109_v21  ;;  %vm113_vm1 = vcmp.eq.f32.partialorder %v109_v21, inf  ;;  %v116_v26 = vand.u32 2147483648, %v109_v21  ;;  %vm115_vm2 = vcmp.eq.f32.partialorder %v109_v21, 0.0 }
 0x15f   :  { %v107_v22 = vpop.xlane.xlu1 %106 }
 0x160   :  { %v110_v23 = vmul.f32 0.032258064, %v107_v22 }
 0x162   :  { %1983 = vrsqrt.f32 %v110_v23  ;;  %vm120_vm3 = vcmp.eq.f32.partialorder %v110_v23, inf  ;;  %v123_v32 = vand.u32 2147483648, %v110_v23  ;;  %vm122_vm4 = vcmp.eq.f32.partialorder %v110_v23, 0.0 }
 0x168   :  { %v1982_v24 = vpop.eup %1981 }
 0x169   :  { %v112_v25 = vmul.f32 %v1982_v24, %v109_v21 }
 0x16b   :  { %v114_v27 = vsel %vm113_vm1, %v109_v21, %v112_v25 }
 0x16c   :  { %v1984_v28 = vpop.eup %1983  ;;  %v117_v29 = vsel %vm115_vm2, %v116_v26, %v114_v27 }
 0x16d   :  { %v119_v30 = vmul.f32 %v1984_v28, %v110_v23  ;;  %v131_v31 = vadd.f32 1e-06, %v117_v29 }
 0x16f   :  { %v121_v33 = vsel %vm120_vm3, %v110_v23, %v119_v30  ;;  %1985 = vrcp.f32 %v131_v31 }
 0x170   :  { %v124_v34 = vsel %vm122_vm4, %v123_v32, %v121_v33 }
 0x171   :  { %v132_v35 = vadd.f32 1e-06, %v124_v34 }
 0x173   :  { %1987 = vrcp.f32 %v132_v35 }
 0x179   :  { %v1986_v38 = vpop.eup %1985 }
 0x17a   :  { %v134_v40 = vmul.f32 %v1986_v38, %v129_v37 }
 0x17c   :  { %v141_v42 = vadd.f32 %v1616_v39, %v134_v40 }
 0x17d   :  { %v1988_v43 = vpop.eup %1987 }
 0x17e   :  { %v136_v44 = vmul.f32 %v1988_v43, %v130_v41  ;;  %1735 = vmatprep.mubr.msk.f32.mxu1 %vm88_vm0, %v141_v42 }
 0x180   :  { %v142_v45 = vadd.f32 %v1616_v39, %v136_v44 }
 0x182   :  { %1736 = vmatmul.mubr.msk.f32.vlgmr.msra.gmra.mrb[0].mxu1 %vm88_vm0, %v142_v45 }
 0x255   :  { %v1737_v47 = vpop.f32.mrb[0].mxu1 }
 0x256   :  { %v225_v48 = vadd.f32 %v1737_v47, %v1617_v46  ;;  %v219_v49 = vpop.f32.mrb[1].mxu1 }
 0x257   :  { %v220_v50 = vadd.f32 %v1617_v46, %v219_v49 }
 0x258   :  { %v2228_v53 = vmul.f32 0.35355338, %v225_v48 }
 0x259   :  { %v2218_v51 = vpack.i.bf16 %v225_v48, %v220_v50  ;;  %v2220_v52 = vmul.f32 0.35355338, %v220_v50 }
 0x25b   :  { %1947 = vrot.lane.b32.xlu1 %v2218_v51, %s2130_s2  ;;  %1942 = vrot.lane.b32.xlu0 %v2218_v51, %s2131_s23 }
 0x25c   :  { %1742 = vmatprep.mubr.msk.f32.mxu1 %vm236_vm5, %v2220_v52 }
 0x25f   :  { %1952 = vrot.lane.b32.xlu0 %v2218_v51, %s2132_s24  ;;  %432 = vrot.lane.b32.xlu1 %v2220_v52, %s2133_s25 }
 0x263   :  { %796 = vrot.lane.b32.xlu0 %v2228_v53, %s2134_s26  ;;  %434 = vrot.lane.b32.xlu1 %v2228_v53, %s2133_s25 }
 0x267   :  { %794 = vrot.lane.b32.xlu1 %v2220_v52, %s2134_s26 }
 0x2cd   :  { %v1948_v54 = vpop.permute.xlu1 %1947  ;;  %v1943_v55 = vpop.permute.xlu0 %1942 }
 0x2ce   :  { %v1950_v56 = vunpack.i.h.bf16 %v1948_v54  ;;  %v1949_v57 = vunpack.i.l.bf16 %v1948_v54  ;;  %v1945_v58 = vunpack.i.h.bf16 %v1943_v55  ;;  %v1944_v59 = vunpack.i.l.bf16 %v1943_v55 }
 0x2d0   :  { %v1852_v61 = vpack.c.bf16 %v1945_v58, %v1944_v59  ;;  %v1862_v62 = vpack.c.bf16 %v1950_v56, %v1949_v57 }
 0x2d1   :  { %v1953_v63 = vpop.permute.xlu0 %1952  ;;  %v433_v4 = vpop.permute.xlu1 %432 }
 0x2d2   :  { %1854 = vmatprep.subr.msk.bf16.mxu1 %vm2235_vm6, %v1852_v61  ;;  %v1955_v2 = vunpack.i.h.bf16 %v1953_v63  ;;  %v1954_v3 = vunpack.i.l.bf16 %v1953_v63 }
 0x2d3   :  { %1857 = vmatpush3.bf16.xpose.msk.msra.mxu1 %vm2235_vm6, %v1852_v61 }
 0x2d4   :  { %1864 = vmatprep.subr.msk.bf16.mxu1 %vm2235_vm6, %v1862_v62  ;;  %v1872_v5 = vpack.c.bf16 %v1955_v2, %v1954_v3 }
 0x2d5   :  { %v435_v6 = vpop.permute.xlu1 %434  ;;  %v797_v8 = vpop.permute.xlu0 %796 }
 0x2d9   :  { %v795_v7 = vpop.permute.xlu1 %794 }
 0x2da   :  { %1743 = vmatmul.mubr.msk.f32.vlgmr.msra.gmra.mrb[2].mxu1 %vm236_vm5, %v2228_v53 }
 0x2db   :  { %1867 = vmatpush3.bf16.xpose.msk.msra.mxu1 %vm2235_vm6, %v1862_v62  ;;  %1756 = vmatprep.mubr.msk.f32.mxu1 %vm236_vm5, %v433_v4 }
 0x2dc   :  { %1874 = vmatprep.subr.msk.bf16.mxu1 %vm2235_vm6, %v1872_v5 }
 0x2e2   :  { %1757 = vmatmul.mubr.msk.f32.vlgmr.msra.gmra.mrb[4].mxu1 %vm236_vm5, %v435_v6 }
 0x2e3   :  { %1877 = vmatpush3.bf16.xpose.msk.msra.mxu1 %vm2235_vm6, %v1872_v5  ;;  %1780 = vmatprep.mubr.msk.f32.mxu1 %vm236_vm5, %v795_v7 }
 0x2ea   :  { %1781 = vmatmul.mubr.msk.f32.vlgmr.msra.gmra.mrb[6].mxu1 %vm236_vm5, %v797_v8 }
 0x3ad   :  { %v1744_v11 = vpop.f32.mrb[2].mxu1 }
 0x3ae   :  { %v319_v12 = vadd.f32 %v1744_v11, %v2257_v9  ;;  %v313_v13 = vpop.f32.mrb[3].mxu1 }
 0x3af   :  { %v314_v14 = vadd.f32 %v313_v13, %v2259_v10 }
 0x3b0   :  { %v326_v15 = vsel %vm322_vm7, %v319_v12, -inf }
 0x3b1   :  { %327 = vmax.xlane.f32.xlu0 %v326_v15  ;;  %v323_v16 = vsel %vm322_vm7, %v314_v14, -inf }
 0x3b2   :  { %324 = vmax.xlane.f32.xlu1 %v323_v16 }
 0x3b5   :  { %v1758_v17 = vpop.f32.mrb[4].mxu1 }
 0x3b6   :  { %v514_v18 = vpop.f32.mrb[5].mxu1  ;;  %v520_v20 = vadd.f32 %v1758_v17, %v2257_v9 }
 0x3b7   :  { %v515_v19 = vadd.f32 %v514_v18, %v2259_v10 }
 0x3b8   :  { %v526_v23 = vsel %vm322_vm7, %v520_v20, -inf }
 0x3b9   :  { %v523_v21 = vsel %vm322_vm7, %v515_v19, -inf }
 0x3ba   :  { %524 = vmax.xlane.f32.xlu0 %v523_v21 }
 0x3bd   :  { %v1782_v22 = vpop.f32.mrb[6].mxu1 }
 0x3be   :  { %v876_v24 = vpop.f32.mrb[7].mxu1  ;;  %527 = vmax.xlane.f32.xlu0 %v526_v23  ;;  %v882_v47 = vadd.f32 %v1782_v22, %v2257_v9 }
 0x3bf   :  { %v877_v45 = vadd.f32 %v876_v24, %v2259_v10 }
 0x3c0   :  { %v888_v48 = vsel %vm322_vm7, %v882_v47, -inf }
 0x3c1   :  { %v885_v46 = vsel %vm322_vm7, %v877_v45, -inf }
 0x43e   :  { %v328_v25 = vpop.xlane.xlu0 %327 }
 0x43f   :  { %v330_v26 = vsub.f32 %v319_v12, %v328_v25  ;;  %v325_v27 = vpop.xlane.xlu1 %324 }
 0x440   :  { %v329_v28 = vsub.f32 %v314_v14, %v325_v27  ;;  %v72_v27 = vld [vmem:[#allocation5 + $0x8] sm:$0xff] }
 0x441   :  { %v333_v29 = vmul.f32 1.442695, %v330_v26  ;;  %v73_v26 = vld [vmem:[#allocation5 + $0x28] sm:$0xff] }
 0x442   :  { %v331_v30 = vmul.f32 1.442695, %v329_v28 }
 0x443   :  { %1989 = vpow2.f32 %v333_v29 }
 0x444   :  { %1991 = vpow2.f32 %v331_v30 }
 0x447   :  { %v525_v31 = vpop.xlane.xlu0 %524 }
 0x448   :  { %v529_v32 = vsub.f32 %v515_v19, %v525_v31 }
 0x44a   :  { %v531_v33 = vmul.f32 1.442695, %v529_v32 }
 0x44b   :  { %v528_v34 = vpop.xlane.xlu0 %527 }
 0x44c   :  { %1993 = vpow2.f32 %v531_v33  ;;  %v530_v35 = vsub.f32 %v520_v20, %v528_v34 }
 0x44d   :  { %v1990_v36 = vpop.eup %1989 }
 0x44e   :  { %v1992_v37 = vpop.eup %1991  ;;  %v533_v38 = vmul.f32 1.442695, %v530_v35  ;;  %v338_v39 = vsel %vm322_vm7, %v1990_v36, 0.0 }
 0x44f   :  { %339 = vadd.xlane.f32.xlu0 %v338_v39  ;;  %v335_v40 = vsel %vm322_vm7, %v1992_v37, 0.0 }
 0x450   :  { %1995 = vpow2.f32 %v533_v38  ;;  %336 = vadd.xlane.f32.xlu1 %v335_v40 }
 0x456   :  { %v1994_v41 = vpop.eup %1993 }
 0x457   :  { %v535_v42 = vsel %vm322_vm7, %v1994_v41, 0.0 }
 0x458   :  { %536 = vadd.xlane.f32.xlu1 %v535_v42 }
 0x45a   :  { %v1996_v43 = vpop.eup %1995 }
 0x45b   :  { %v538_v44 = vsel %vm322_vm7, %v1996_v43, 0.0 }
 0x45c   :  { %539 = vadd.xlane.f32.xlu0 %v538_v44 }
 0x469   :  { %1957 = vrot.lane.b32.xlu1 %v2218_v51, %s2135_s27 }
 0x46d   :  { %1967 = vrot.lane.b32.xlu1 %v2218_v51, %s2136_s28 }
 0x471   :  { %1077 = vrot.lane.b32.xlu1 %v2220_v52, %s2137_s29 }
 0x472   :  { %1962 = vrot.lane.b32.xlu0 %v2218_v51, %s2138_s30 }
 0x475   :  { %1079 = vrot.lane.b32.xlu1 %v2228_v53, %s2137_s29 }
 0x491   :  { %886 = vmax.xlane.f32.xlu0 %v885_v46 }
 0x499   :  { %889 = vmax.xlane.f32.xlu1 %v888_v48 }
 0x4dc   :  { %v340_v50 = vpop.xlane.xlu0 %339 }
 0x4dd   :  { %v337_v49 = vpop.xlane.xlu1 %336 }
 0x4de   :  { %1997 = vrcp.f32 %v337_v49 }
 0x4df   :  { %1999 = vrcp.f32 %v340_v50 }
 0x4e5   :  { %v537_v52 = vpop.xlane.xlu1 %536 }
 0x4e6   :  { %2001 = vrcp.f32 %v537_v52 }
 0x4e8   :  { %v1998_v54 = vpop.eup %1997 }
 0x4e9   :  { %v540_v55 = vpop.xlane.xlu0 %539  ;;  %v1958_v56 = vpop.permute.xlu1 %1957  ;;  %v343_v53 = vmul.f32 %v1998_v54, %v1992_v37 }
 0x4ea   :  { %2003 = vrcp.f32 %v540_v55  ;;  %v1960_v57 = vunpack.i.h.bf16 %v1958_v56  ;;  %v1959_v58 = vunpack.i.l.bf16 %v1958_v56  ;;  %v2000_v61 = vpop.eup %1999 }
 0x4eb   :  { %1749 = vmatprep.mubr.msk.f32.mxu0 %vm322_vm7, %v343_v53  ;;  %v344_v11 = vmul.f32 %v2000_v61, %v1990_v36 }
 0x4ec   :  { %v1858_v59 = vpack.c.bf16 %v1960_v57, %v1959_v58 }
 0x4ed   :  { %v1963_v62 = vpop.permute.xlu0 %1962  ;;  %v1968_v63 = vpop.permute.xlu1 %1967 }
 0x4ee   :  { %v1965_v2 = vunpack.i.h.bf16 %v1963_v62  ;;  %v1964_v3 = vunpack.i.l.bf16 %v1963_v62  ;;  %v1970_v4 = vunpack.i.h.bf16 %v1968_v63  ;;  %v1969_v5 = vunpack.i.l.bf16 %v1968_v63  ;;  %1859 = vmatprep.subr.bf16.mxu0 %v1858_v59 }
 0x4ef   :  { %1861 = vmatpush3.bf16.msra.mxu0 %v1858_v59 }
 0x4f0   :  { %v2002_v6 = vpop.eup %2001  ;;  %v1868_v7 = vpack.c.bf16 %v1965_v2, %v1964_v3  ;;  %v1882_v8 = vpack.c.bf16 %v1970_v4, %v1969_v5  ;;  %v75_v5 = vld [vmem:[#allocation5 + $0x68] sm:$0xff] }
 0x4f1   :  { %v1078_v12 = vpop.permute.xlu1 %1077  ;;  %v543_v13 = vmul.f32 %v2002_v6, %v1994_v41 }
 0x4f2   :  { %1750 = vmatmul.mubr.msk.f32.vlgmr.msra.gmra.mrb[0].mxu0 %vm322_vm7, %v344_v11  ;;  %1869 = vmatprep.subr.bf16.mxu0 %v1868_v7 }
 0x4f3   :  { %1884 = vmatprep.subr.msk.bf16.mxu1 %vm2235_vm6, %v1882_v8  ;;  %1799 = vmatprep.mubr.msk.f32.mxu1 %vm236_vm5, %v1078_v12 }
 0x4f4   :  { %v2004_v14 = vpop.eup %2003  ;;  %1871 = vmatpush3.bf16.msra.mxu0 %v1868_v7  ;;  %1763 = vmatprep.mubr.msk.f32.mxu0 %vm322_vm7, %v543_v13  ;;  %v1652_v13 = vld [vmem:[#allocation7 + $0x15] ss:$0 sm:$0xff] }
 0x4f5   :  { %v544_v15 = vmul.f32 %v2004_v14, %v1996_v43  ;;  %1887 = vmatpush3.bf16.xpose.msk.msra.mxu1 %vm2235_vm6, %v1882_v8  ;;  %v1080_v16 = vpop.permute.xlu1 %1079  ;;  %1766 = vmatprep.subr.mxu0 %v73_v26 }
 0x4f7   :  { %1764 = vmatmul.mubr.msk.f32.vlgmr.msra.gmra.mrb[2].mxu0 %vm322_vm7, %v544_v15 }
 0x4f8   :  { %1767 = vmatpush3.msra.mxu0 %v73_v26 }
 0x4f9   :  { %1771 = vmatprep.subr.mxu0 %v72_v27 }
 0x4fc   :  { %1800 = vmatmul.mubr.msk.f32.vlgmr.msra.gmra.mrb[8].mxu1 %vm236_vm5, %v1080_v16 }
 0x51e   :  { %v887_v17 = vpop.xlane.xlu0 %886 }
 0x51f   :  { %v891_v18 = vsub.f32 %v877_v45, %v887_v17 }
 0x521   :  { %v893_v21 = vmul.f32 1.442695, %v891_v18 }
 0x526   :  { %v890_v19 = vpop.xlane.xlu1 %889 }
 0x527   :  { %v892_v20 = vsub.f32 %v882_v47, %v890_v19 }
 0x529   :  { %v895_v22 = vmul.f32 1.442695, %v892_v20 }
 0x52b   :  { %2005 = vpow2.f32 %v895_v22 }
 0x52c   :  { %2007 = vpow2.f32 %v893_v21 }
 0x535   :  { %v2006_v23 = vpop.eup %2005 }
 0x536   :  { %v900_v24 = vsel %vm322_vm7, %v2006_v23, 0.0  ;;  %v2008_v25 = vpop.eup %2007 }
 0x537   :  { %901 = vadd.xlane.f32.xlu0 %v900_v24  ;;  %v897_v60 = vsel %vm322_vm7, %v2008_v25, 0.0 }
 0x53b   :  { %898 = vadd.xlane.f32.xlu0 %v897_v60 }
 0x551   :  { %1972 = vrot.lane.b32.xlu0 %v2218_v51, %s2139_s4 }
 0x5c4   :  { %v902_v28 = vpop.xlane.xlu0 %901 }
 0x5c5   :  { %v1751_v29 = vpop.f32.mrb[0].mxu0 }
 0x5c6   :  { %v423_v30 = vpop.f32.mrb[1].mxu0 }
 0x5c8   :  { %v899_v31 = vpop.xlane.xlu0 %898 }
 0x5c9   :  { %2009 = vrcp.f32 %v899_v31  ;;  %v78_v31 = vld [vmem:[#allocation5 + $0x50] sm:$0xff] }
 0x5ca   :  { %2011 = vrcp.f32 %v902_v28  ;;  %v1765_v32 = vpop.f32.mrb[2].mxu0 }
 0x5cb   :  { %v623_v33 = vpop.f32.mrb[3].mxu0 }
 0x5cc   :  { %v1973_v34 = vpop.permute.xlu0 %1972  ;;  %1768 = vmatprep.mubr.msk.f32.mxu0 %vm236_vm5, %v623_v33  ;;  %v79_v33 = vld [vmem:[#allocation5 + $0x70] sm:$0xff] }
 0x5cd   :  { %v1975_v35 = vunpack.i.h.bf16 %v1973_v34  ;;  %v1974_v36 = vunpack.i.l.bf16 %v1973_v34  ;;  %1769 = vmatmul.mubr.msk.f32.vlgmr.msra.gmra.mrb[4].mxu0 %vm236_vm5, %v1765_v32  ;;  %v1896_v34 = vpack.c.bf16 %v79_v33, %v78_v31 }
 0x5ce   :  { %1773 = vmatprep.mubr.msk.f32.mxu0 %vm236_vm5, %v423_v30  ;;  %1772 = vmatpush3.msra.mxu0 %v72_v27  ;;  %v77_v30 = vld [vmem:[#allocation5 + $0x30] sm:$0xff] }
 0x5cf   :  { %v1878_v37 = vpack.c.bf16 %v1975_v35, %v1974_v36  ;;  %v1801_v38 = vpop.f32.mrb[8].mxu1  ;;  %v80_v35 = vld [vmem:[#allocation5 + $0x18] sm:$0xff] }
 0x5d0   :  { %v1159_v39 = vpop.f32.mrb[9].mxu1  ;;  %v1165_v42 = vadd.f32 %v1801_v38, %v2257_v9  ;;  %v81_v36 = vld [vmem:[#allocation5 + $0x38] sm:$0xff] }
 0x5d1   :  { %v1160_v40 = vadd.f32 %v1159_v39, %v2259_v10  ;;  %1879 = vmatprep.subr.bf16.mxu0 %v1878_v37  ;;  %v74_v10 = vld [vmem:[#allocation5 + $0x48] sm:$0xff]  ;;  %v1900_v38 = vpack.c.bf16 %v81_v36, %v80_v35  ;;  %v83_v39 = vld [vmem:[#allocation5 + $0x78] sm:$0xff] }
 0x5d2   :  { %v1171_v47 = vsel %vm322_vm7, %v1165_v42, -inf }
 0x5d3   :  { %v2010_v41 = vpop.eup %2009  ;;  %v1168_v43 = vsel %vm322_vm7, %v1160_v40, -inf }
 0x5d4   :  { %v2012_v44 = vpop.eup %2011  ;;  %1169 = vmax.xlane.f32.xlu1 %v1168_v43  ;;  %v905_v45 = vmul.f32 %v2010_v41, %v2008_v25  ;;  %v84_v41 = vld [vmem:[#allocation5 + $0x98] sm:$0xff] }
 0x5d5   :  { %1774 = vmatmul.mubr.msk.f32.vlgmr.msra.gmra.mrb[4].mxu0 %vm236_vm5, %v1751_v29  ;;  %v906_v46 = vmul.f32 %v2012_v44, %v2006_v23  ;;  %v76_v29 = vld [vmem:[#allocation5 + $0x10] sm:$0xff] }
 0x5d6   :  { %1881 = vmatpush3.bf16.msra.mxu0 %v1878_v37  ;;  %1787 = vmatprep.mubr.msk.f32.mxu0 %vm322_vm7, %v905_v45  ;;  %v1892_v32 = vpack.c.bf16 %v77_v30, %v76_v29  ;;  %v82_v37 = vld [vmem:[#allocation5 + $0x58] sm:$0xff] }
 0x5d7   :  { %1790 = vmatprep.subr.mxu0 %v74_v10 }
 0x5d8   :  { %1172 = vmax.xlane.f32.xlu1 %v1171_v47  ;;  %1893 = vmatprep.subr.bf16.mxu1 %v1892_v32 }
 0x5d9   :  { %1788 = vmatmul.mubr.msk.f32.vlgmr.msra.gmra.mrb[6].mxu0 %vm322_vm7, %v906_v46  ;;  %1895 = vmatpush3.bf16.msra.mxu1 %v1892_v32 }
 0x5da   :  { %1791 = vmatpush3.msra.mxu0 %v74_v10  ;;  %1897 = vmatprep.subr.bf16.mxu1 %v1896_v34 }
 0x5dd   :  { %1899 = vmatpush3.bf16.msra.mxu1 %v1896_v34 }
 0x661   :  { %v1170_v9 = vpop.xlane.xlu1 %1169 }
 0x662   :  { %v1174_v48 = vsub.f32 %v1160_v40, %v1170_v9  ;;  %v1904_v40 = vpack.c.bf16 %v83_v39, %v82_v37 }
 0x664   :  { %v1176_v52 = vmul.f32 1.442695, %v1174_v48 }
 0x665   :  { %v1173_v49 = vpop.xlane.xlu1 %1172 }
 0x666   :  { %v1175_v50 = vsub.f32 %v1165_v42, %v1173_v49  ;;  %v85_v42 = vld [vmem:[#allocation5 + $0xb8] sm:$0xff] }
 0x667   :  { %v1908_v43 = vpack.c.bf16 %v85_v42, %v84_v41 }
 0x668   :  { %v1178_v54 = vmul.f32 1.442695, %v1175_v50 }
 0x66a   :  { %2013 = vpow2.f32 %v1178_v54 }
 0x66b   :  { %2015 = vpow2.f32 %v1176_v52 }
 0x674   :  { %v2014_v55 = vpop.eup %2013 }
 0x675   :  { %v1183_v56 = vsel %vm322_vm7, %v2014_v55, 0.0  ;;  %v2016_v53 = vpop.eup %2015 }
 0x676   :  { %1184 = vadd.xlane.f32.xlu1 %v1183_v56  ;;  %v1180_v57 = vsel %vm322_vm7, %v2016_v53, 0.0 }
 0x67a   :  { %1181 = vadd.xlane.f32.xlu1 %v1180_v57 }
 0x68b   :  { %1977 = vrot.lane.b32.xlu1 %v2218_v51, %s2140_s5 }
 0x6ac   :  { %v1789_v58 = vpop.f32.mrb[6].mxu0 }
 0x6ad   :  { %v985_v59 = vpop.f32.mrb[7].mxu0 }
 0x6ae   :  { %1792 = vmatprep.mubr.msk.f32.mxu0 %vm236_vm5, %v985_v59  ;;  %v1653_v59 = vld [vmem:[#allocation7 + $0x13] ss:$0 sm:$0xff] }
 0x6af   :  { %1793 = vmatmul.mubr.msk.f32.vlgmr.msra.gmra.mrb[4].mxu0 %vm236_vm5, %v1789_v58 }
 0x703   :  { %v1185_v61 = vpop.xlane.xlu1 %1184 }
 0x704   :  { %2017 = vrcp.f32 %v1185_v61 }
 0x707   :  { %v1182_v62 = vpop.xlane.xlu1 %1181 }
 0x708   :  { %2019 = vrcp.f32 %v1182_v62 }
 0x70b   :  { %v1978_v63 = vpop.permute.xlu1 %1977 }
 0x70c   :  { %v1980_v2 = vunpack.i.h.bf16 %v1978_v63  ;;  %v1979_v3 = vunpack.i.l.bf16 %v1978_v63  ;;  %v1654_v63 = vld [vmem:[#allocation7 + $0x14] ss:$0 sm:$0xff] }
 0x70e   :  { %v1888_v4 = vpack.c.bf16 %v1980_v2, %v1979_v3  ;;  %v2018_v6 = vpop.eup %2017 }
 0x70f   :  { %v1189_v8 = vmul.f32 %v2018_v6, %v2014_v55 }
 0x710   :  { %1889 = vmatprep.subr.bf16.mxu0 %v1888_v4 }
 0x711   :  { %1891 = vmatpush3.bf16.msra.mxu0 %v1888_v4 }
 0x712   :  { %v2020_v7 = vpop.eup %2019  ;;  %1809 = vmatprep.subr.mxu0 %v75_v5 }
 0x713   :  { %v1188_v51 = vmul.f32 %v2020_v7, %v2016_v53 }
 0x715   :  { %1806 = vmatprep.mubr.msk.f32.mxu0 %vm322_vm7, %v1188_v51  ;;  %v86_v51 = vld [vmem:[#allocation5 + $0xd8] sm:$0xff] }
 0x716   :  { %1807 = vmatmul.mubr.msk.f32.vlgmr.msra.gmra.mrb[8].mxu0 %vm322_vm7, %v1189_v8  ;;  %v87_v8 = vld [vmem:[#allocation5 + $0xf8] sm:$0xff] }
 0x717   :  { %1810 = vmatpush3.msra.mxu0 %v75_v5 }
 0x718   :  { %1901 = vmatprep.subr.bf16.mxu0 %v1900_v38 }
 0x7e9   :  { %v1808_v11 = vpop.f32.mrb[8].mxu0 }
 0x7ea   :  { %v1268_v12 = vpop.f32.mrb[9].mxu0 }
 0x7eb   :  { %1811 = vmatprep.mubr.msk.f32.mxu0 %vm236_vm5, %v1268_v12  ;;  %v1655_v12 = vld [vmem:[#allocation7 + $0x17] ss:$0 sm:$0xff] }
 0x7ec   :  { %1812 = vmatmul.mubr.msk.f32.vlgmr.msra.gmra.mrb[4].mxu0 %vm236_vm5, %v1808_v11  ;;  %v1912_v11 = vpack.c.bf16 %v87_v8, %v86_v51 }
 0x7ed   :  { %1903 = vmatpush3.bf16.msra.mxu0 %v1900_v38 }
 0x7ee   :  { %1905 = vmatprep.subr.bf16.mxu0 %v1904_v40 }
 0x7f1   :  { %1907 = vmatpush3.bf16.msra.mxu0 %v1904_v40 }
 0x7f2   :  { %1909 = vmatprep.subr.bf16.mxu0 %v1908_v43 }
 0x7f5   :  { %1911 = vmatpush3.bf16.msra.mxu0 %v1908_v43 }
 0x7f6   :  { %1913 = vmatprep.subr.bf16.mxu0 %v1912_v11 }
 0x7f9   :  { %1915 = vmatpush3.bf16.msra.mxu0 %v1912_v11 }
 0x8bf   :  { %v1813_v14 = vpop.f32.mrb[4].mxu0 }
 0x8c0   :  { %v1361_v15 = vadd.f32 %v1813_v14, %v2206_v1  ;;  %v1349_v16 = vpop.f32.mrb[5].mxu0 }
 0x8c1   :  { %v1360_v17 = vadd.f32 %v1349_v16, %v2204_v0 }
 0x8c2   :  { %v2316_v18 = vadd.f32 %v1652_v13, %v1361_v15 }
 0x8c3   :  { %v2318_v19 = vadd.f32 %v1652_v13, %v1360_v17 }
 0x8c4   :  { %v1371_v20 = vsel %vm88_vm0, %v2316_v18, 0.0 }
 0x8c5   :  { %1372 = vadd.xlane.f32.xlu1 %v1371_v20  ;;  %v1368_v21 = vsel %vm88_vm0, %v2318_v19, 0.0 }
 0x8c6   :  { %1369 = vadd.xlane.f32.xlu0 %v1368_v21  ;;  %v1658_v21 = vld [vmem:[#allocation7 + $0x16] ss:$0 sm:$0xff] }
 0x952   :  { %v1373_v22 = vpop.xlane.xlu1 %1372 }
 0x953   :  { %v1375_v23 = vmul.f32 0.03125, %v1373_v22  ;;  %v1370_v24 = vpop.xlane.xlu0 %1369 }
 0x954   :  { %v1374_v25 = vmul.f32 0.03125, %v1370_v24 }
 0x955   :  { %v1377_v1 = vsub.f32 %v2316_v18, %v1375_v23 }
 0x956   :  { %v1376_v0 = vsub.f32 %v2318_v19, %v1374_v25 }
 0x957   :  { %v1379_v27 = vmul.f32 %v1377_v1, %v1377_v1  ;;  %v1407_v3 = vmul.f32 %v1653_v59, %v1377_v1 }
 0x958   :  { %v1378_v60 = vmul.f32 %v1376_v0, %v1376_v0  ;;  %v1406_v61 = vmul.f32 %v1653_v59, %v1376_v0 }
 0x959   :  { %v1383_v28 = vsel %vm88_vm0, %v1379_v27, 0.0 }
 0x95a   :  { %v1380_v26 = vsel %vm88_vm0, %v1378_v60, 0.0 }
 0x95b   :  { %1381 = vadd.xlane.f32.xlu0 %v1380_v26 }
 0x95f   :  { %1384 = vadd.xlane.f32.xlu0 %v1383_v28 }
 0x9e8   :  { %v1382_v44 = vpop.xlane.xlu0 %1381 }
 0x9e9   :  { %v1386_v45 = vmul.f32 0.032258064, %v1382_v44 }
 0x9eb   :  { %2021 = vrsqrt.f32 %v1386_v45  ;;  %vm1390_vm8 = vcmp.eq.f32.partialorder %v1386_v45, inf  ;;  %v1393_v48 = vand.u32 2147483648, %v1386_v45  ;;  %vm1392_vm9 = vcmp.eq.f32.partialorder %v1386_v45, 0.0 }
 0x9ec   :  { %v1385_v46 = vpop.xlane.xlu0 %1384 }
 0x9ed   :  { %v1387_v47 = vmul.f32 0.032258064, %v1385_v46 }
 0x9ef   :  { %2023 = vrsqrt.f32 %v1387_v47  ;;  %vm1397_vm10 = vcmp.eq.f32.partialorder %v1387_v47, inf  ;;  %v1400_v56 = vand.u32 2147483648, %v1387_v47  ;;  %vm1399_vm11 = vcmp.eq.f32.partialorder %v1387_v47, 0.0 }
 0x9f5   :  { %v2022_v10 = vpop.eup %2021 }
 0x9f6   :  { %v1389_v9 = vmul.f32 %v2022_v10, %v1386_v45 }
 0x9f8   :  { %v1391_v49 = vsel %vm1390_vm8, %v1386_v45, %v1389_v9 }
 0x9f9   :  { %v2024_v50 = vpop.eup %2023  ;;  %v1394_v52 = vsel %vm1392_vm9, %v1393_v48, %v1391_v49 }
 0x9fa   :  { %v1396_v54 = vmul.f32 %v2024_v50, %v1387_v47  ;;  %v1408_v55 = vadd.f32 1e-06, %v1394_v52 }
 0x9fc   :  { %v1398_v53 = vsel %vm1397_vm10, %v1387_v47, %v1396_v54  ;;  %2025 = vrcp.f32 %v1408_v55 }
 0x9fd   :  { %v1401_v57 = vsel %vm1399_vm11, %v1400_v56, %v1398_v53 }
 0x9fe   :  { %v1409_v58 = vadd.f32 1e-06, %v1401_v57 }
 0xa00   :  { %2027 = vrcp.f32 %v1409_v58 }
 0xa06   :  { %v2026_v62 = vpop.eup %2025 }
 0xa07   :  { %v1411_v2 = vmul.f32 %v2026_v62, %v1406_v61 }
 0xa09   :  { %v1418_v4 = vadd.f32 %v1654_v63, %v1411_v2 }
 0xa0a   :  { %v2028_v5 = vpop.eup %2027 }
 0xa0b   :  { %v1413_v6 = vmul.f32 %v2028_v5, %v1407_v3  ;;  %1822 = vmatprep.mubr.msk.f32.mxu1 %vm88_vm0, %v1418_v4 }
 0xa0d   :  { %v1419_v7 = vadd.f32 %v1654_v63, %v1413_v6 }
 0xa0f   :  { %1823 = vmatmul.mubr.msk.f32.vlgmr.msra.gmra.mrb[10].mxu1 %vm88_vm0, %v1419_v7 }
 0xae2   :  { %v1824_v13 = vpop.f32.mrb[10].mxu1 }
 0xae3   :  { %v1502_v14 = vadd.f32 %v1824_v13, %v1655_v12  ;;  %v1496_v15 = vpop.f32.mrb[11].mxu1 }
 0xae4   :  { %v1497_v16 = vadd.f32 %v1655_v12, %v1496_v15 }
 0xae5   :  { %v1506_v20 = vmax.f32 %v1502_v14, 0.0 }
 0xae6   :  { %v1505_v17 = vmax.f32 %v1497_v16, 0.0 }
 0xae8   :  { %1841 = vmatprep.mubr.msk.f32.mxu0 %vm1511_vm12, %v1505_v17 }
 0xae9   :  { %1842 = vmatmul.mubr.msk.f32.vlgmr.msra.gmra.mrb[10].mxu0 %vm1511_vm12, %v1506_v20 }
 0xbbc   :  { %v1843_v22 = vpop.f32.mrb[10].mxu0 }
 0xbbd   :  { %v1590_v23 = vadd.f32 %v1843_v22, %v1658_v21  ;;  %v1584_v24 = vpop.f32.mrb[11].mxu0 }
 0xbbe   :  { %v1585_v25 = vadd.f32 %v1658_v21, %v1584_v24 }
 0xbbf   :  { %v1594_v1 = vadd.f32 %v1590_v23, %v2316_v18 }
 0xbc0   :  { %v1593_v0 = vadd.f32 %v1585_v25, %v2318_v19 }
 0xbc1   :  { %1596 = vst.msk [vmem:[#allocation8 + $0x8] sm:$0xff] %vm88_vm0, %v1594_v1 }
 0xbc2   :  { %1595 = vst.msk [vmem:[#allocation8] sm:$0xff] %vm88_vm0, %v1593_v0 }
 0xbc3   :  { %2106 = shalt.err (!%p2103_p0)
}
 0xbc4   :  { %s2107_s12 = scalar_lea.hbm %s2352_s3, 256 }
 0xbc5   :  { %p2108_p1 = scmp.ne.s32.totalorder %s2352_s3, %s2107_s12  ;;  %p2111_p2 = scmp.lt.u32.totalorder %s2107_s12, %s2352_s3 }
 0xbc7   :  { %p2113_p3 = pnand %p2111_p2, %p2108_p1 }
 0xbc9   :  { %2116 = shalt.err (!%p2113_p3)
}
 0xbca   :  { %1608 = dma.vmem_to_hbm [thread:$0]  %s1603_s7, 256, %s2352_s3, [#allocation4], %s2127_s1, %s2127_s1, %s2128_s9  }
 0xbcb   :  { %2121 = dma.done.wait [#allocation4], 256  }
 0xbcc   :  { %2122 = vsyncadd [#allocation4], 4294967040 }
 0xbcd   :  { %1612 = vsyncpa [#allocation3], 1 }
 0xbce   :  { %1613 = vsyncpa [#allocation6], 1 }
 0xbcf   :  { %1614 = vsyncpa [#allocation4], 1 }

</bundles_post_ra>
